<compile_context>
chip_gen: v7x
topology: tpu7x:2x2x1
jax: 0.10.0
libtpu: 0.0.40
codegen_flags: <defaults>
</compile_context>

<pallas_src>
import functools

import jax
import jax.numpy as jnp
from jax.experimental import pallas as pl
from jax.experimental.pallas import tpu as pltpu

_LANE = 128
_SUBLANE = 8


def _round_up(x, m):
    return ((x + m - 1) // m) * m


def _classifier_kernel(z_ref, w1_ref, b1_ref, w2_ref, b2_ref, out_ref, *, out_node):
    z = z_ref[...]                                                      # (TB, H)
    # fc1 + ReLU (accumulate in f32 on the MXU; epilogue stays f32).
    h = jnp.dot(z, w1_ref[...], preferred_element_type=jnp.float32) + b1_ref[...]
    h = jnp.maximum(h, 0.0)
    # TODO(synk): nn.Dropout(p=0.5) is identity in eval mode; training-mode RNG
    #             mask/scaling is intentionally not reproduced here.
    # fc2 -> padded-to-128-lane logits slab (padding lanes have w=0, b=0).
    logits = (jnp.dot(h.astype(w2_ref.dtype), w2_ref[...],
                      preferred_element_type=jnp.float32) + b2_ref[...])  # (TB, OUT_PAD)
    if out_node == 1:
        # Padding lanes produce sigmoid(0)=0.5; sliced off by the wrapper.
        out_ref[...] = jax.nn.sigmoid(logits)
    else:
        # LogSoftmax along dim=1 over the *valid* lanes only (mask the padding).
        lane = jax.lax.broadcasted_iota(jnp.int32, logits.shape, 1)
        masked = jnp.where(lane < out_node, logits, jnp.float32(-1e30))
        m = jnp.max(masked, axis=1, keepdims=True)
        shifted = masked - m
        lse = jnp.log(jnp.sum(jnp.exp(shifted), axis=1, keepdims=True))
        out_ref[...] = shifted - lse


def classifier_forward(z, w1_t, b1, w2_t, b2, *, out_node, use_bf16=False):
    """z: (B, hidden_dim); w1_t: (hidden_dim, num_node); b1: (1, num_node);
    w2_t: (num_node, out_node); b2: (1, out_node).  Returns (B, out_node) f32."""
    B, H = z.shape
    num_node = w1_t.shape[1]
    assert w1_t.shape == (H, num_node)
    assert w2_t.shape == (num_node, out_node)

    # Lane-dense output: pad the output feature dim to a multiple of 128.
    out_pad = _round_up(max(out_node, 1), _LANE)
    w2_p = jnp.zeros((num_node, out_pad), jnp.float32).at[:, :out_node].set(w2_t)
    b2_p = jnp.zeros((1, out_pad), jnp.float32).at[:, :out_node].set(b2)
    b1 = b1.reshape(1, num_node).astype(jnp.float32)

    # Batch tile: as large as sensible (<=512) and a multiple of the sublane (8).
    TB = min(512, _round_up(B, _SUBLANE))
    B_pad = _round_up(B, TB)
    if B_pad != B:
        z = jnp.pad(z, ((0, B_pad - B), (0, 0)))
    grid = (B_pad // TB,)

    in_dtype = jnp.bfloat16 if use_bf16 else jnp.float32
    z_in = z.astype(in_dtype)
    w1_in = w1_t.astype(in_dtype)
    w2_in = w2_p.astype(in_dtype)

    itemsize = jnp.dtype(in_dtype).itemsize
    # VMEM budget: 2x double-buffered z tile + 2x out tile + resident weights + slack.
    vmem_bytes = (2 * TB * H * itemsize
                  + 2 * TB * out_pad * 4
                  + (H * num_node + num_node * out_pad) * itemsize
                  + (num_node + out_pad) * 4
                  + (4 << 20))
    vmem_bytes = min(max(vmem_bytes, 8 << 20), 96 << 20)

    cost = pl.CostEstimate(
        flops=2 * B * (H * num_node + num_node * out_node),
        transcendentals=B * max(out_node, 1),
        bytes_accessed=(z_in.size * itemsize
                        + (w1_in.size + w2_in.size) * itemsize
                        + (b1.size + b2_p.size) * 4
                        + B_pad * out_pad * 4),
    )

    kernel = functools.partial(_classifier_kernel, out_node=out_node)
    out_padded = pl.pallas_call(
        kernel,
        out_shape=jax.ShapeDtypeStruct((B_pad, out_pad), jnp.float32),
        grid_spec=pltpu.PrefetchScalarGridSpec(
            num_scalar_prefetch=0,
            grid=grid,
            in_specs=[
                pl.BlockSpec((TB, H), lambda i: (i, 0)),           # z tile (streamed)
                pl.BlockSpec((H, num_node), lambda i: (0, 0)),     # w1 (resident)
                pl.BlockSpec((1, num_node), lambda i: (0, 0)),     # b1 (resident)
                pl.BlockSpec((num_node, out_pad), lambda i: (0, 0)),  # w2 (resident)
                pl.BlockSpec((1, out_pad), lambda i: (0, 0)),      # b2 (resident)
            ],
            out_specs=pl.BlockSpec((TB, out_pad), lambda i: (i, 0)),
        ),
        compiler_params=pltpu.CompilerParams(
            dimension_semantics=("parallel",),
            vmem_limit_bytes=int(vmem_bytes),
        ),
        cost_estimate=cost,
    )(z_in, w1_in, b1, w2_in, b2_p)

    return out_padded[:B, :out_node]


def _reference_forward(z, w1_t, b1, w2_t, b2, out_node):
    h = jnp.maximum(z @ w1_t + b1, 0.0)
    logits = h @ w2_t + b2
    if out_node == 1:
        return jax.nn.sigmoid(logits)
    return jax.nn.log_softmax(logits, axis=1)


if __name__ == "__main__":
    # Small shapes consistent with the module's forward.
    batch, hidden_dim, num_node, out_node = 8, 32, 64, 10

    key = jax.random.PRNGKey(0)
    kz, kw1, kb1, kw2, kb2 = jax.random.split(key, 5)

    z = jax.random.normal(kz, (batch, hidden_dim), dtype=jnp.float32)

    # Deterministic synthetic parameter init (PyTorch-Linear-like uniform bounds).
    bound1 = 1.0 / (hidden_dim ** 0.5)
    w1_t = jax.random.uniform(kw1, (hidden_dim, num_node), jnp.float32, -bound1, bound1)
    b1 = jax.random.uniform(kb1, (1, num_node), jnp.float32, -bound1, bound1)
    bound2 = 1.0 / (num_node ** 0.5)
    w2_t = jax.random.uniform(kw2, (num_node, out_node), jnp.float32, -bound2, bound2)
    b2 = jax.random.uniform(kb2, (1, out_node), jnp.float32, -bound2, bound2)

    # f32 path: tight tolerance vs. JAX reference.
    out = classifier_forward(z, w1_t, b1, w2_t, b2, out_node=out_node)
    out = jax.block_until_ready(out)
    ref = _reference_forward(z, w1_t, b1, w2_t, b2, out_node)
    assert out.shape == (batch, out_node)
    assert jnp.allclose(out, ref, atol=1e-5, rtol=1e-5), "mismatch vs JAX reference (f32)"

    # out_node == 1 (Sigmoid) branch.
    w2s_t = jax.random.uniform(kw2, (num_node, 1), jnp.float32, -bound2, bound2)
    b2s = jax.random.uniform(kb2, (1, 1), jnp.float32, -bound2, bound2)
    out_sig = jax.block_until_ready(
        classifier_forward(z, w1_t, b1, w2s_t, b2s, out_node=1)
    )
    ref_sig = _reference_forward(z, w1_t, b1, w2s_t, b2s, 1)
    assert out_sig.shape == (batch, 1)
    assert jnp.allclose(out_sig, ref_sig, atol=1e-5, rtol=1e-5), "mismatch (sigmoid)"

    # bf16-input path (halves the HBM stream of z for large B); loose tolerance.
    out_bf = jax.block_until_ready(
        classifier_forward(z, w1_t, b1, w2_t, b2, out_node=out_node, use_bf16=True)
    )
    assert jnp.allclose(out_bf, ref, atol=3e-2, rtol=3e-2), "mismatch (bf16 inputs)"

    # Non-divisible batch to exercise batch-tile padding/slicing.
    z_odd = jax.random.normal(kz, (13, hidden_dim), dtype=jnp.float32)
    out_odd = jax.block_until_ready(
        classifier_forward(z_odd, w1_t, b1, w2_t, b2, out_node=out_node)
    )
    ref_odd = _reference_forward(z_odd, w1_t, b1, w2_t, b2, out_node)
    assert out_odd.shape == (13, out_node)
    assert jnp.allclose(out_odd, ref_odd, atol=1e-5, rtol=1e-5), "mismatch (odd batch)"

    print("KERNEL_OK")
</pallas_src>

<mosaic_0001>
module attributes {stable_mosaic.version = 11 : i64} {
  func.func @_classifier_kernel(%arg0: i32, %arg1: memref<8x32xf32, #tpu.memory_space<vmem>>, %arg2: memref<32x64xf32, #tpu.memory_space<vmem>>, %arg3: memref<1x64xf32, #tpu.memory_space<vmem>>, %arg4: memref<64x128xf32, #tpu.memory_space<vmem>>, %arg5: memref<1x128xf32, #tpu.memory_space<vmem>>, %arg6: memref<8x128xf32, #tpu.memory_space<vmem>>) attributes {dimension_semantics = [#tpu.dimension_semantics<parallel>], iteration_bounds = array<i64: 1>, scalar_prefetch = 0 : i64, scratch_operands = 0 : i64, tpu.core_type = #tpu.core_type<tc>, window_params = [{transform_indices = @transform_0, window_bounds = array<i64: 8, 32>}, {pipeline_mode = #tpu.pipeline_mode<synchronous>, transform_indices = @transform_1, window_bounds = array<i64: 32, 64>}, {pipeline_mode = #tpu.pipeline_mode<synchronous>, transform_indices = @transform_2, window_bounds = array<i64: 1, 64>}, {pipeline_mode = #tpu.pipeline_mode<synchronous>, transform_indices = @transform_3, window_bounds = array<i64: 64, 128>}, {pipeline_mode = #tpu.pipeline_mode<synchronous>, transform_indices = @transform_4, window_bounds = array<i64: 1, 128>}, {transform_indices = @transform_5, window_bounds = array<i64: 8, 128>}]} {
    %c0 = arith.constant 0 : index
    %c0_0 = arith.constant 0 : index
    %0 = vector.load %arg1[%c0, %c0_0] : memref<8x32xf32, #tpu.memory_space<vmem>>, vector<8x32xf32>
    %c0_1 = arith.constant 0 : index
    %c0_2 = arith.constant 0 : index
    %1 = vector.load %arg2[%c0_1, %c0_2] : memref<32x64xf32, #tpu.memory_space<vmem>>, vector<32x64xf32>
    %cst = arith.constant dense<0.000000e+00> : vector<8x64xf32>
    %2 = tpu.matmul %0, %1, %cst {dimension_numbers = #tpu.dot_dimension_numbers<[1], [0], [0], [1], [0, 0, 1, 1], [], []>} : vector<8x32xf32>, vector<32x64xf32>, vector<8x64xf32> -> vector<8x64xf32>
    %c0_3 = arith.constant 0 : index
    %c0_4 = arith.constant 0 : index
    %3 = vector.load %arg3[%c0_3, %c0_4] : memref<1x64xf32, #tpu.memory_space<vmem>>, vector<1x64xf32>
    %4 = vector.broadcast %3 : vector<1x64xf32> to vector<8x64xf32>
    %5 = arith.addf %2, %4 : vector<8x64xf32>
    %cst_5 = arith.constant 0.000000e+00 : f32
    %6 = vector.broadcast %cst_5 : f32 to vector<8x64xf32>
    %7 = arith.maximumf %5, %6 : vector<8x64xf32>
    %c0_6 = arith.constant 0 : index
    %c0_7 = arith.constant 0 : index
    %8 = vector.load %arg4[%c0_6, %c0_7] : memref<64x128xf32, #tpu.memory_space<vmem>>, vector<64x128xf32>
    %cst_8 = arith.constant dense<0.000000e+00> : vector<8x128xf32>
    %9 = tpu.matmul %7, %8, %cst_8 {dimension_numbers = #tpu.dot_dimension_numbers<[1], [0], [0], [1], [0, 0, 1, 1], [], []>} : vector<8x64xf32>, vector<64x128xf32>, vector<8x128xf32> -> vector<8x128xf32>
    %c0_9 = arith.constant 0 : index
    %c0_10 = arith.constant 0 : index
    %10 = vector.load %arg5[%c0_9, %c0_10] : memref<1x128xf32, #tpu.memory_space<vmem>>, vector<1x128xf32>
    %11 = vector.broadcast %10 : vector<1x128xf32> to vector<8x128xf32>
    %12 = arith.addf %9, %11 : vector<8x128xf32>
    %13 = tpu.iota {dimensions = array<i32: 1>} : vector<8x128xi32>
    %c10_i32 = arith.constant 10 : i32
    %14 = vector.broadcast %c10_i32 : i32 to vector<8x128xi32>
    %15 = arith.cmpi slt, %13, %14 : vector<8x128xi32>
    %cst_11 = arith.constant -1.000000e+30 : f32
    %16 = vector.broadcast %cst_11 : f32 to vector<8x128xf32>
    %17 = arith.select %15, %12, %16 : vector<8x128xi1>, vector<8x128xf32>
    %cst_12 = arith.constant dense<0xFF800000> : vector<8xf32>
    %18 = vector.multi_reduction <maximumf>, %17, %cst_12 [1] : vector<8x128xf32> to vector<8xf32>
    %19 = vector.shape_cast %18 : vector<8xf32> to vector<8x1xf32>
    %20 = vector.broadcast %19 : vector<8x1xf32> to vector<8x128xf32>
    %21 = arith.subf %17, %20 : vector<8x128xf32>
    %22 = math.exp %21 : vector<8x128xf32>
    %cst_13 = arith.constant dense<0.000000e+00> : vector<8xf32>
    %23 = vector.multi_reduction <add>, %22, %cst_13 [1] : vector<8x128xf32> to vector<8xf32>
    %24 = vector.shape_cast %23 : vector<8xf32> to vector<8x1xf32>
    %25 = math.log %24 : vector<8x1xf32>
    %26 = vector.broadcast %25 : vector<8x1xf32> to vector<8x128xf32>
    %27 = arith.subf %21, %26 : vector<8x128xf32>
    %c0_14 = arith.constant 0 : index
    %c0_15 = arith.constant 0 : index
    %28 = vector.load %arg6[%c0_14, %c0_15] : memref<8x128xf32, #tpu.memory_space<vmem>>, vector<8x128xf32>
    tpu.vector_store %arg6[%c0_14, %c0_15], %27 {strides = array<i32>} : memref<8x128xf32, #tpu.memory_space<vmem>>, vector<8x128xf32>,
    return
  }
  func.func @transform_0(%arg0: i32) -> (i32, i32) {
    %c0_i32 = arith.constant 0 : i32
    %c0_i32_0 = arith.constant 0 : i32
    return %arg0, %c0_i32 : i32, i32
  }
  func.func @transform_1(%arg0: i32) -> (i32, i32) {
    %c0_i32 = arith.constant 0 : i32
    %c0_i32_0 = arith.constant 0 : i32
    %c0_i32_1 = arith.constant 0 : i32
    return %c0_i32, %c0_i32_0 : i32, i32
  }
  func.func @transform_2(%arg0: i32) -> (i32, i32) {
    %c0_i32 = arith.constant 0 : i32
    %c0_i32_0 = arith.constant 0 : i32
    %c0_i32_1 = arith.constant 0 : i32
    return %c0_i32, %c0_i32_0 : i32, i32
  }
  func.func @transform_3(%arg0: i32) -> (i32, i32) {
    %c0_i32 = arith.constant 0 : i32
    %c0_i32_0 = arith.constant 0 : i32
    %c0_i32_1 = arith.constant 0 : i32
    return %c0_i32, %c0_i32_0 : i32, i32
  }
  func.func @transform_4(%arg0: i32) -> (i32, i32) {
    %c0_i32 = arith.constant 0 : i32
    %c0_i32_0 = arith.constant 0 : i32
    %c0_i32_1 = arith.constant 0 : i32
    return %c0_i32, %c0_i32_0 : i32, i32
  }
  func.func @transform_5(%arg0: i32) -> (i32, i32) {
    %c0_i32 = arith.constant 0 : i32
    %c0_i32_0 = arith.constant 0 : i32
    return %arg0, %c0_i32 : i32, i32
  }
}

</mosaic_0001>

<bundles_post_ra>
// kernel: tpu_custom_call.1
= control target key start
LH: loop header
LB: loop body
LE: loop exit
PB: predicated region body
PF: predicated region fallthrough
CT: control target
= control target key end

     0   :  { %10 = vsyncpa [#allocation3], 0  ;;  %s539_s0 = inlined_call_operand.hbm [shape: f32[8,32], index: 0, kind: input, shape index: {}]   ;;  %s540_s1 = inlined_call_operand.hbm [shape: f32[32,64], index: 1, kind: input, shape index: {}]   ;;  %s541_s2 = inlined_call_operand.vmem [shape: f32[1,64], index: 2, kind: input, shape index: {}]   ;;  %s542_s3 = inlined_call_operand.hbm [shape: f32[64,128], index: 3, kind: input, shape index: {}]   ;;  %s543_s4 = inlined_call_operand.vmem [shape: f32[1,128], index: 4, kind: input, shape index: {}]   ;;  %s544_s5 = inlined_call_operand.hbm [shape: f32[8,128], index: 5, kind: output, shape index: {}]  }
   0x1   :  { %11 = vsyncpa [#allocation6], 0 }
   0x2   :  { %12 = vsyncpa [#allocation4], 0  ;;  %s440_s18 = smov [#allocation5]   ;;  %s346_s22 = scalar_lea.hbm %s540_s1, 512 }
   0x3   :  { %s28_s19 = sshll.u32 %s440_s18, 4  ;;  %p347_p0 = scmp.ne.s32.totalorder %s540_s1, %s346_s22  ;;  %s29_s19 = int_to_ptr.vmem [resolvable:$true] %s28_s19 }
   0x4   :  { %p350_p1 = scmp.lt.u32.totalorder %s346_s22, %s540_s1 }
   0x6   :  { %p352_p2 = pnand %p350_p1, %p347_p0 }
   0x8   :  { %355 = shalt.err (!%p352_p2)
}
   0x9   :  { %s356_s27 = scalar_lea.vmem %s29_s19, 512  ;;  %p361_p4 = scmp.lt.s32.totalorder %s29_s19, %s29_s19 }
   0xa   :  { %p357_p3 = scmp.ne.s32.totalorder %s29_s19, %s356_s27  ;;  %p362_p5 = scmp.lt.s32.totalorder %s356_s27, %s356_s27 }
   0xc   :  { %p363_p6 = por %p362_p5, %p361_p4 }
   0xe   :  { %p364_p7 = pnand %p363_p6, %p357_p3 }
  0x10   :  { %367 = shalt.err (!%p364_p7)
}
  0x11   :  { %s441_s28 = smov 128   ;;  %s442_s29 = smov 8  }
  0x12   :  { %34 = dma.hbm_to_vmem [thread:$0]  %s540_s1, 512, %s29_s19, [#allocation6], %s441_s28, %s441_s28, %s442_s29  }
  0x13   :  { %s443_s7 = smov [#allocation2]   ;;  %s444_s9 = smov [#allocation7]  }
  0x14   :  { %s19_s8 = sshll.u32 %s443_s7, 4  ;;  %s42_s10 = sshll.u32 %s444_s9, 4  ;;  %s20_s8 = int_to_ptr.vmem [resolvable:$true] %s19_s8  ;;  %s43_s10 = int_to_ptr.vmem [resolvable:$true] %s42_s10 }
  0x15   :  { %s368_s13 = scalar_lea.hbm %s539_s0, 128 }
  0x16   :  { %p369_p8 = scmp.ne.s32.totalorder %s539_s0, %s368_s13  ;;  %p372_p9 = scmp.lt.u32.totalorder %s368_s13, %s539_s0 }
  0x18   :  { %p374_p10 = pnand %p372_p9, %p369_p8 }
  0x1a   :  { %377 = shalt.err (!%p374_p10)
}
  0x1b   :  { %s378_s1 = scalar_lea.vmem %s20_s8, 128  ;;  %p383_p12 = scmp.lt.s32.totalorder %s20_s8, %s20_s8 }
  0x1c   :  { %p379_p11 = scmp.ne.s32.totalorder %s20_s8, %s378_s1  ;;  %p384_p13 = scmp.lt.s32.totalorder %s378_s1, %s378_s1 }
  0x1e   :  { %p385_p0 = por %p384_p13, %p383_p12 }
  0x20   :  { %p386_p1 = pnand %p385_p0, %p379_p11 }
  0x22   :  { %389 = shalt.err (!%p386_p1)
}
  0x23   :  { %22 = dma.hbm_to_vmem [thread:$0]  %s539_s0, 128, %s20_s8, [#allocation3]  }
  0x24   :  { %s390_s22 = scalar_lea.hbm %s542_s3, 1024 }
  0x25   :  { %p391_p2 = scmp.ne.s32.totalorder %s542_s3, %s390_s22  ;;  %p394_p3 = scmp.lt.u32.totalorder %s390_s22, %s542_s3 }
  0x27   :  { %p396_p4 = pnand %p394_p3, %p391_p2 }
  0x29   :  { %399 = shalt.err (!%p396_p4)
}
  0x2a   :  { %s400_s27 = scalar_lea.vmem %s43_s10, 1024  ;;  %p405_p6 = scmp.lt.s32.totalorder %s43_s10, %s43_s10 }
  0x2b   :  { %p401_p5 = scmp.ne.s32.totalorder %s43_s10, %s400_s27  ;;  %p406_p7 = scmp.lt.s32.totalorder %s400_s27, %s400_s27 }
  0x2d   :  { %p407_p8 = por %p406_p7, %p405_p6 }
  0x2f   :  { %p408_p9 = pnand %p407_p8, %p401_p5 }
  0x31   :  { %411 = shalt.err (!%p408_p9)
}
  0x32   :  { %48 = dma.hbm_to_vmem [thread:$0]  %s542_s3, 1024, %s43_s10, [#allocation6], %s441_s28, %s441_s28, %s442_s29  }
  0x33   :  { %434 = dma.done.wait [#allocation3], 128  }
  0x34   :  { %435 = vsyncadd [#allocation3], 4294967168 }
  0x35   :  { %436 = dma.done.wait [#allocation6], 1536  }
  0x36   :  { %437 = vsyncadd [#allocation6], 4294965760  ;;  %v445_v0 = vmov 0.0|0.0   ;;  %vm446_vm0 = vmmov 0   ;;  %v447_v1 = vmov 0.0   ;;  %v61_v2 = vld [vmem:[#allocation5] sm:$0xff]  ;;  %v236_v26 = vlaneseq }
  0x37   :  { %315 = vmatprep.subr.bf16.mxu0 %v445_v0  ;;  %293 = vmatprep.mubr.msk.f32.mxu0 %vm446_vm0, %v447_v1  ;;  %v62_v3 = vld [vmem:[#allocation5 + $0x8] sm:$0xff]  ;;  %v63_v4 = vld [vmem:[#allocation5 + $0x10] sm:$0xff]  ;;  %v64_v6 = vld [vmem:[#allocation5 + $0x18] sm:$0xff]  ;;  %vm72_vm1 = vcmask 261120   ;;  %vm162_vm2 = vcmask 523264  }
  0x38   :  { %321 = vmatprep.subr.bf16.mxu1 %v445_v0  ;;  %312 = vmatprep.mubr.msk.f32.mxu1 %vm446_vm0, %v447_v1  ;;  %v316_v5 = vpack.c.bf16 %v62_v3, %v61_v2  ;;  %v147_v7 = vld [vmem:[#allocation7] sm:$0xff]  ;;  %v148_v8 = vld [vmem:[#allocation7 + $0x8] sm:$0xff]  ;;  %v149_v9 = vld [vmem:[#allocation7 + $0x10] sm:$0xff]  ;;  %v319_v11 = vpack.c.bf16 %v64_v6, %v63_v4  ;;  %v237_v27 = vand.u32 127, %v236_v26 }
  0x39   :  { %v150_v10 = vld [vmem:[#allocation7 + $0x18] sm:$0xff]  ;;  %v322_v12 = vpack.c.bf16 %v148_v8, %v147_v7  ;;  %v151_v14 = vld [vmem:[#allocation7 + $0x20] sm:$0xff]  ;;  %v152_v15 = vld [vmem:[#allocation7 + $0x28] sm:$0xff] }
  0x3a   :  { %317 = vmatpush3.bf16.msra.mxu0 %v316_v5  ;;  %v325_v13 = vpack.c.bf16 %v150_v10, %v149_v9  ;;  %v60_v16 = vld [vmem:[#allocation2] sm:$0xff]  ;;  %v328_v17 = vpack.c.bf16 %v152_v15, %v151_v14  ;;  %v153_v18 = vld [vmem:[#allocation7 + $0x30] sm:$0xff]  ;;  %vm238_vm3 = vcmp.lt.s32.totalorder %v237_v27, 10 }
  0x3b   :  { %318 = vmatprep.subr.bf16.mxu0 %v445_v0  ;;  %323 = vmatpush3.bf16.msra.mxu1 %v322_v12  ;;  %v154_v19 = vld [vmem:[#allocation7 + $0x38] sm:$0xff] }
  0x3c   :  { %324 = vmatprep.subr.bf16.mxu1 %v445_v0  ;;  %v331_v20 = vpack.c.bf16 %v154_v19, %v153_v18  ;;  %v267_v21 = vld [vmem:[%s541_s2] ss:$0 sm:$0xff]  ;;  %s448_s2 = smov [#allocation8]  }
  0x3d   :  { %v269_v28 = vld [vmem:[%s543_s4] ss:$0 sm:$0xff]  ;;  %s257_s7 = sshll.u32 %s448_s2, 4  ;;  %s258_s7 = int_to_ptr.vmem [resolvable:$true] %s257_s7 }
  0x3e   :  { %320 = vmatpush3.bf16.msra.mxu0 %v319_v11  ;;  %s412_s4 = scalar_lea.vmem %s258_s7, 128  ;;  %p417_p11 = scmp.lt.s32.totalorder %s258_s7, %s258_s7 }
  0x3f   :  { %326 = vmatpush3.bf16.msra.mxu1 %v325_v13  ;;  %p413_p10 = scmp.ne.s32.totalorder %s258_s7, %s412_s4  ;;  %p418_p12 = scmp.lt.s32.totalorder %s412_s4, %s412_s4 }
  0x40   :  { %327 = vmatprep.subr.bf16.mxu1 %v445_v0 }
  0x41   :  { %294 = vmatmul.mubr.msk.f32.vlgmr.msra.gmra.mrb[0].mxu0 %vm72_vm1, %v60_v16  ;;  %p419_p13 = por %p418_p12, %p417_p11 }
  0x43   :  { %329 = vmatpush3.bf16.msra.mxu1 %v328_v17  ;;  %p420_p0 = pnand %p419_p13, %p413_p10 }
  0x44   :  { %330 = vmatprep.subr.bf16.mxu1 %v445_v0 }
  0x47   :  { %332 = vmatpush3.bf16.msra.mxu1 %v331_v20 }
 0x114   :  { %v142_v22 = vpop.f32.mrb[0].mxu0 }
 0x115   :  { %v143_v23 = vadd.f32 %v267_v21, %v142_v22  ;;  %v295_v24 = vpop.f32.mrb[1].mxu0 }
 0x117   :  { %v146_v25 = vmax.f32 %v143_v23, 0.0 }
 0x119   :  { %313 = vmatmul.mubr.msk.f32.vlgmr.msra.gmra.mrb[0].mxu1 %vm162_vm2, %v146_v25 }
 0x1ec   :  { %v232_v29 = vpop.f32.mrb[0].mxu1 }
 0x1ed   :  { %v233_v30 = vadd.f32 %v269_v28, %v232_v29  ;;  %v314_v31 = vpop.f32.mrb[1].mxu1 }
 0x1ef   :  { %v239_v32 = vsel %vm238_vm3, %v233_v30, -1e+30 }
 0x1f0   :  { %240 = vmax.xlane.f32.xlu0 %v239_v32 }
 0x27d   :  { %v241_v33 = vpop.xlane.xlu0 %240 }
 0x27e   :  { %v242_v34 = vsub.f32 %v239_v32, %v241_v33 }
 0x280   :  { %v243_v35 = vmul.f32 1.442695, %v242_v34 }
 0x282   :  { %342 = vpow2.f32 %v243_v35 }
 0x28c   :  { %v343_v36 = vpop.eup %342 }
 0x28d   :  { %245 = vadd.xlane.f32.xlu0 %v343_v36 }
 0x31a   :  { %v246_v37 = vpop.xlane.xlu0 %245 }
 0x31b   :  { %344 = vlog2.f32 %v246_v37 }
 0x325   :  { %v345_v38 = vpop.eup %344 }
 0x326   :  { %v248_v39 = vmul.f32 0.6931472, %v345_v38 }
 0x328   :  { %v249_v40 = vsub.f32 %v242_v34, %v248_v39 }
 0x32a   :  { %250 = vst [vmem:[#allocation8] sm:$0xff] %v249_v40 }
 0x32b   :  { %423 = shalt.err (!%p420_p0)
}
 0x32c   :  { %s424_s10 = scalar_lea.hbm %s544_s5, 128 }
 0x32d   :  { %p425_p1 = scmp.ne.s32.totalorder %s544_s5, %s424_s10  ;;  %p428_p2 = scmp.lt.u32.totalorder %s424_s10, %s544_s5 }
 0x32f   :  { %p430_p3 = pnand %p428_p2, %p425_p1 }
 0x331   :  { %433 = shalt.err (!%p430_p3)
}
 0x332   :  { %260 = dma.vmem_to_hbm [thread:$0]  %s258_s7, 128, %s544_s5, [#allocation4]  }
 0x333   :  { %438 = dma.done.wait [#allocation4], 128  }
 0x334   :  { %439 = vsyncadd [#allocation4], 4294967168 }
 0x335   :  { %264 = vsyncpa [#allocation3], 1 }
 0x336   :  { %265 = vsyncpa [#allocation6], 1 }
 0x337   :  { %266 = vsyncpa [#allocation4], 1 }

</bundles_post_ra>
